<compile_context>
chip_gen: v6e
topology: v6e:2x2x1
jax: 0.10.0
libtpu: 0.0.40
codegen_flags: <defaults>
</compile_context>

<pallas_src>
import functools

import jax
import jax.numpy as jnp
from jax.experimental import pallas as pl
from jax.experimental.pallas import tpu as pltpu

LN_EPS = 1e-5                       # torch.nn.LayerNorm default eps
VMEM_LIMIT = 48 * 1024 * 1024       # scoped VMEM budget: safe on v5e/v6e (128 MiB) and v7x (64 MiB)
TM_TARGET = 256                     # row-tile target (sublane axis), 8-aligned
TN_TARGET = 512                     # output-column tile target (lane axis), 128-aligned


def _row_tile(m):
    """Full dim when small, else an 8/128-friendly fixed tile; grid uses pl.cdiv."""
    return m if m <= TM_TARGET else TM_TARGET


def _col_tile(n):
    return n if n <= TN_TARGET else TN_TARGET


def _gelu_f32(x):
    # TODO(synk): timm Block uses exact-erf GELU; tanh approximation differs by ~1e-3.
    c = 0.7978845608028654  # sqrt(2/pi)
    return 0.5 * x * (1.0 + jnp.tanh(c * (x + 0.044715 * x * x * x)))


# ----------------------------- Pallas kernels ------------------------------

def _patchify_kernel(x_ref, w_ref, b_ref, pos_ref, o_ref):
    """Per-batch patch matmul + bias + positional embedding (fused)."""
    x = x_ref[0].astype(jnp.bfloat16)                                   # (T, C*P)
    y = jnp.dot(x, w_ref[...], preferred_element_type=jnp.float32)      # (T, D) f32
    o_ref[0] = (y + b_ref[...] + pos_ref[...]).astype(o_ref.dtype)


def patchify(xp, w, b, pos):
    """xp: (B, T, C*P) -> (B, T, D);   y = xp @ w + b + pos  (pos broadcast over batch)."""
    B, T, CP = xp.shape
    D = w.shape[1]
    return pl.pallas_call(
        _patchify_kernel,
        grid=(B,),
        in_specs=[pl.BlockSpec((1, T, CP), lambda b_: (b_, 0, 0)),
                  pl.BlockSpec((CP, D), lambda b_: (0, 0)),
                  pl.BlockSpec((1, D), lambda b_: (0, 0)),
                  pl.BlockSpec((T, D), lambda b_: (0, 0))],
        out_specs=pl.BlockSpec((1, T, D), lambda b_: (b_, 0, 0)),
        out_shape=jax.ShapeDtypeStruct((B, T, D), jnp.float32),
        compiler_params=pltpu.CompilerParams(
            dimension_semantics=("parallel",), vmem_limit_bytes=VMEM_LIMIT),
    )(xp, w, b, pos)


def _ln_qkv_kernel(x_ref, g_ref, bln_ref, w_ref, b_ref, o_ref, h_scratch):
    """LayerNorm (computed once per batch, reused) + one Dh-wide QKV column tile.

    grid = (B, 3H).  Output is written head-major: (3H, B, N, Dh)."""
    @pl.when(pl.program_id(1) == 0)
    def _():
        x = x_ref[0].astype(jnp.float32)                                # (N, D)
        mean = jnp.mean(x, axis=-1, keepdims=True)
        xc = x - mean
        var = jnp.mean(xc * xc, axis=-1, keepdims=True)
        hnorm = xc * jax.lax.rsqrt(var + LN_EPS) * g_ref[...] + bln_ref[...]
        h_scratch[...] = hnorm.astype(h_scratch.dtype)                  # bf16 LN'd rows

    y = jnp.dot(h_scratch[...], w_ref[0], preferred_element_type=jnp.float32)   # (N, Dh)
    o_ref[0, 0] = (y + b_ref[0]).astype(o_ref.dtype)


def ln_qkv(x, gamma, beta, w3, b3):
    """x: (B, N, D) f32 -> head-major qkv (3H, B, N, Dh) bf16.

    w3: (3H, D, Dh) bf16 with jh = which*H + h (q heads, then k heads, then v heads)."""
    B, N, D = x.shape
    threeH, _, Dh = w3.shape
    return pl.pallas_call(
        _ln_qkv_kernel,
        grid=(B, threeH),
        in_specs=[pl.BlockSpec((1, N, D), lambda b, j: (b, 0, 0)),
                  pl.BlockSpec((1, D), lambda b, j: (0, 0)),
                  pl.BlockSpec((1, D), lambda b, j: (0, 0)),
                  pl.BlockSpec((1, D, Dh), lambda b, j: (j, 0, 0)),
                  pl.BlockSpec((1, 1, Dh), lambda b, j: (j, 0, 0))],
        out_specs=pl.BlockSpec((1, 1, N, Dh), lambda b, j: (j, b, 0, 0)),
        out_shape=jax.ShapeDtypeStruct((threeH, B, N, Dh), jnp.bfloat16),
        scratch_shapes=[pltpu.VMEM((N, D), jnp.bfloat16)],
        compiler_params=pltpu.CompilerParams(
            dimension_semantics=("parallel", "arbitrary"),   # LN scratch reused over the jh axis
            vmem_limit_bytes=VMEM_LIMIT),
    )(x, gamma, beta, w3, b3)


def _attn_proj_kernel(q_ref, k_ref, v_ref, wp_ref, bp_ref, res_ref, o_ref, *, scale):
    """Per-batch multi-head attention with all heads batched in one dot_general, fused with the
    output projection (+ bias) and the residual add."""
    H, _, N, Dh = q_ref.shape
    q = q_ref[...].reshape(H, N, Dh)                                    # bf16, head-contiguous
    k = k_ref[...].reshape(H, N, Dh)
    v = v_ref[...].reshape(H, N, Dh)

    # scores (H, N, N): batched over heads, bf16 operands, f32 accumulation.
    s = jax.lax.dot_general(q, k, (((2,), (2,)), ((0,), (0,))),
                            preferred_element_type=jnp.float32) * scale
    s = s - jnp.max(s, axis=-1, keepdims=True)
    p = jnp.exp(s)
    p = p / jnp.sum(p, axis=-1, keepdims=True)                          # exact softmax

    # context (H, N, Dh)
    o = jax.lax.dot_general(p.astype(v.dtype), v, (((2,), (1,)), ((0,), (0,))),
                            preferred_element_type=jnp.float32)

    # fused output projection: sum_h o_h @ Wp[h] (+ bias + residual), all in VMEM.
    acc = res_ref[0].astype(jnp.float32) + bp_ref[...]                  # (N, D)
    for h in range(H):
        acc = acc + jnp.dot(o[h].astype(jnp.bfloat16), wp_ref[h],
                            preferred_element_type=jnp.float32)
    o_ref[0] = acc.astype(o_ref.dtype)


def attn_proj_residual(qkv, proj_w, proj_b, x_res, num_heads):
    """qkv: (3H, B, N, Dh) bf16; proj_w: (H, Dh, D) bf16; x_res: (B, N, D) f32 -> (B, N, D) f32."""
    threeH, B, N, Dh = qkv.shape
    H = num_heads
    D = x_res.shape[-1]
    scale = float(Dh) ** -0.5
    kern = functools.partial(_attn_proj_kernel, scale=scale)
    return pl.pallas_call(
        kern,
        grid=(B,),
        in_specs=[pl.BlockSpec((H, 1, N, Dh), lambda b: (0, b, 0, 0)),   # q heads
                  pl.BlockSpec((H, 1, N, Dh), lambda b: (1, b, 0, 0)),   # k heads
                  pl.BlockSpec((H, 1, N, Dh), lambda b: (2, b, 0, 0)),   # v heads
                  pl.BlockSpec((H, Dh, D), lambda b: (0, 0, 0)),
                  pl.BlockSpec((1, D), lambda b: (0, 0)),
                  pl.BlockSpec((1, N, D), lambda b: (b, 0, 0))],
        out_specs=pl.BlockSpec((1, N, D), lambda b: (b, 0, 0)),
        out_shape=jax.ShapeDtypeStruct((B, N, D), x_res.dtype),
        compiler_params=pltpu.CompilerParams(
            dimension_semantics=("parallel",), vmem_limit_bytes=VMEM_LIMIT),
    )(qkv, qkv, qkv, proj_w, proj_b, x_res)


def _ln_mlp_kernel(x_ref, g_ref, bln_ref, w1_ref, b1_ref, w2_ref, b2_ref, o_ref):
    """Fused MLP: LN + fc1 + GELU + fc2 + residual; the (tm, 4D) hidden never leaves VMEM."""
    x = x_ref[...].astype(jnp.float32)                                  # (tm, D)
    mean = jnp.mean(x, axis=-1, keepdims=True)
    xc = x - mean
    var = jnp.mean(xc * xc, axis=-1, keepdims=True)
    h = xc * jax.lax.rsqrt(var + LN_EPS) * g_ref[...] + bln_ref[...]
    u = jnp.dot(h.astype(jnp.bfloat16), w1_ref[...],
                preferred_element_type=jnp.float32) + b1_ref[...]       # (tm, 4D) f32
    u = _gelu_f32(u)
    y = jnp.dot(u.astype(jnp.bfloat16), w2_ref[...],
                preferred_element_type=jnp.float32) + b2_ref[...]       # (tm, D) f32
    o_ref[...] = (y + x).astype(o_ref.dtype)


def ln_mlp_residual(x2, gamma, beta, w1, b1, w2, b2):
    """x2: (M, D) f32 -> (M, D) f32.  Whole-D / whole-4D weight panels kept resident in VMEM."""
    # TODO(synk): K-tile fc2 over the 4D hidden for very large emb_dim (>~2k) to bound VMEM.
    M, D = x2.shape
    D4 = w1.shape[1]
    tm = _row_tile(M)
    return pl.pallas_call(
        _ln_mlp_kernel,
        grid=(pl.cdiv(M, tm),),
        in_specs=[pl.BlockSpec((tm, D), lambda i: (i, 0)),
                  pl.BlockSpec((1, D), lambda i: (0, 0)),
                  pl.BlockSpec((1, D), lambda i: (0, 0)),
                  pl.BlockSpec((D, D4), lambda i: (0, 0)),
                  pl.BlockSpec((1, D4), lambda i: (0, 0)),
                  pl.BlockSpec((D4, D), lambda i: (0, 0)),
                  pl.BlockSpec((1, D), lambda i: (0, 0))],
        out_specs=pl.BlockSpec((tm, D), lambda i: (i, 0)),
        out_shape=jax.ShapeDtypeStruct((M, D), x2.dtype),
        compiler_params=pltpu.CompilerParams(
            dimension_semantics=("parallel",), vmem_limit_bytes=VMEM_LIMIT),
    )(x2, gamma, beta, w1, b1, w2, b2)


def _layernorm_kernel(x_ref, g_ref, b_ref, o_ref):
    x = x_ref[...].astype(jnp.float32)
    mean = jnp.mean(x, axis=-1, keepdims=True)
    xc = x - mean
    var = jnp.mean(xc * xc, axis=-1, keepdims=True)
    y = xc * jax.lax.rsqrt(var + LN_EPS)
    o_ref[...] = (y * g_ref[...] + b_ref[...]).astype(o_ref.dtype)


def layernorm(x2, gamma, beta):
    """Standalone LayerNorm (encoder final LN), cdiv-tiled over rows."""
    M, D = x2.shape
    tm = _row_tile(M)
    return pl.pallas_call(
        _layernorm_kernel,
        grid=(pl.cdiv(M, tm),),
        in_specs=[pl.BlockSpec((tm, D), lambda i: (i, 0)),
                  pl.BlockSpec((1, D), lambda i: (0, 0)),
                  pl.BlockSpec((1, D), lambda i: (0, 0))],
        out_specs=pl.BlockSpec((tm, D), lambda i: (i, 0)),
        out_shape=jax.ShapeDtypeStruct((M, D), x2.dtype),
        compiler_params=pltpu.CompilerParams(
            dimension_semantics=("parallel",), vmem_limit_bytes=VMEM_LIMIT),
    )(x2, gamma, beta)


def _linear_kernel(x_ref, w_ref, b_ref, o_ref):
    y = jnp.dot(x_ref[...].astype(jnp.bfloat16), w_ref[...].astype(jnp.bfloat16),
                preferred_element_type=jnp.float32)
    o_ref[...] = (y + b_ref[...].astype(jnp.float32)).astype(o_ref.dtype)


def linear(x2, w, b):
    """Generic y = x2 @ w + b (decoder head).  Whole-K blocks; M/N tiled with cdiv grids."""
    # TODO(synk): K-tiling with an f32 accumulator for very large contraction dims.
    M, K = x2.shape
    N = w.shape[1]
    tm, tn = _row_tile(M), _col_tile(N)
    return pl.pallas_call(
        _linear_kernel,
        grid=(pl.cdiv(M, tm), pl.cdiv(N, tn)),
        in_specs=[pl.BlockSpec((tm, K), lambda i, j: (i, 0)),
                  pl.BlockSpec((K, tn), lambda i, j: (0, j)),
                  pl.BlockSpec((1, tn), lambda i, j: (0, j))],
        out_specs=pl.BlockSpec((tm, tn), lambda i, j: (i, j)),
        out_shape=jax.ShapeDtypeStruct((M, N), x2.dtype),
        compiler_params=pltpu.CompilerParams(
            dimension_semantics=("parallel", "parallel"), vmem_limit_bytes=VMEM_LIMIT),
    )(x2, w, b)


# ----------------------------- model (JAX glue around kernels) --------------

def block_forward(x, p, num_heads):
    """timm-style ViT Block: x + proj(Attn(LN(x))); x + MLP(LN(x)). 3 pallas_calls."""
    B, N, D = x.shape
    qkv = ln_qkv(x, p["norm1_g"], p["norm1_b"], p["qkv_w"], p["qkv_b"])       # (3H, B, N, Dh) bf16
    x = attn_proj_residual(qkv, p["proj_w"], p["proj_b"], x, num_heads)       # (B, N, D) f32
    x2 = ln_mlp_residual(x.reshape(B * N, D), p["norm2_g"], p["norm2_b"],
                         p["fc1_w"], p["fc1_b"], p["fc2_w"], p["fc2_b"])
    return x2.reshape(B, N, D)


def encoder_forward(img, ep, cfg, shuffle_key):
    B, C, L = img.shape
    P, D = cfg["patch_size"], cfg["emb_dim"]
    T = L // P

    # Conv1d(C, D, kernel=P, stride=P) == per-patch matmul; pos-embedding add fused in-kernel.
    x = img.reshape(B, C, T, P).transpose(0, 2, 1, 3).reshape(B, T, C * P)
    patches = patchify(x, ep["patch_w"], ep["patch_b"], ep["pos_embedding"])  # (B, T, D)

    # PatchShuffle (torch.randperm replaced by deterministic, vmapped jax.random.permutation).
    remain_T = int(T * (1.0 - cfg["mask_ratio"]))
    keys = jax.random.split(shuffle_key, B)
    forward_indexes = jax.vmap(lambda k: jax.random.permutation(k, T))(keys)  # (B, T)
    selected_forward = forward_indexes[:, :remain_T]                          # (B, remain_T)
    selected_backward = jnp.argsort(selected_forward, axis=1)                 # (B, remain_T)
    patches = jnp.take_along_axis(patches, selected_forward[:, :, None], axis=1)

    cls = jnp.broadcast_to(ep["cls_token"].reshape(1, 1, D), (B, 1, D))
    x = jnp.concatenate([cls, patches], axis=1)                               # (B, N, D)

    for bp in ep["blocks"]:
        x = block_forward(x, bp, cfg["encoder_head"])
    Bx, N, _ = x.shape
    x = layernorm(x.reshape(Bx * N, D), ep["ln_g"], ep["ln_b"]).reshape(Bx, N, D)
    return x, selected_backward                                               # (B, N, D), (B, remain_T)


def decoder_forward(features, backward_indexes, dp, cfg):
    B, Nf, D = features.shape
    P, C = cfg["patch_size"], cfg["n_channel"]

    bidx = jnp.concatenate(
        [jnp.zeros((B, 1), jnp.int32), backward_indexes.astype(jnp.int32) + 1], axis=1)
    Ttot = bidx.shape[1]
    n_extra = Ttot - Nf
    if n_extra > 0:
        extra = jnp.broadcast_to(dp["mask_token"].reshape(1, 1, D), (B, n_extra, D))
        features = jnp.concatenate([features, extra], axis=1)
    features = jnp.take_along_axis(features, bidx[:, :, None], axis=1)        # (B, T+1, D)
    assert features.shape[1] == dp["pos_embedding"].shape[0], \
        "Mismatch between features and positional embeddings in decoder"
    x = features + dp["pos_embedding"][None]

    for bp in dp["blocks"]:
        x = block_forward(x, bp, cfg["decoder_head"])
    x = x[:, 1:]                                                              # drop cls -> (B, T, D)
    Tn = x.shape[1]

    patches = linear(x.reshape(B * Tn, D), dp["head_w"], dp["head_b"]).reshape(B, Tn, C * P)

    mask = jnp.zeros_like(patches)
    num_masked = Tn - Nf + 1
    if num_masked > 0:
        mask = mask.at[:, -num_masked:].set(1.0)
    new_backward = bidx[:, 1:] - 1
    mask = jnp.take_along_axis(mask, new_backward[:, :, None], axis=1)

    def patch2sequ(p):   # 'h b (c p1) -> b c (h p1)'  (here: (B, T, C*P) -> (B, C, T*P))
        return p.reshape(B, Tn, C, P).transpose(0, 2, 1, 3).reshape(B, C, Tn * P)

    return patch2sequ(patches), patch2sequ(mask)


def mae_vit_forward(img, params, cfg, shuffle_key):
    features, backward_indexes = encoder_forward(img, params["encoder"], cfg, shuffle_key)
    predicted_img, mask = decoder_forward(features, backward_indexes, params["decoder"], cfg)
    return predicted_img, mask


# ----------------------------- deterministic parameter init -----------------

def init_params(key, cfg):
    D = cfg["emb_dim"]
    C = cfg["n_channel"]
    P = cfg["patch_size"]
    T = cfg["n_length"] // P
    kit = iter(jax.random.split(key, 256))

    def nrm(shape, std=0.02):
        return jax.random.normal(next(kit), shape, jnp.float32) * std

    def blk(H):
        Dh = D // H
        # qkv weight in (in=D, out=3D) layout -> head-major (3H, D, Dh): jh = which*H + h.
        qkv_w = nrm((D, 3 * D)).reshape(D, 3, H, Dh).transpose(1, 2, 0, 3).reshape(3 * H, D, Dh)
        proj_w = nrm((D, D)).reshape(H, Dh, D)        # rows h*Dh+dh -> per-head (Dh, D) panels
        return dict(
            norm1_g=jnp.ones((1, D), jnp.float32), norm1_b=jnp.zeros((1, D), jnp.float32),
            qkv_w=qkv_w.astype(jnp.bfloat16), qkv_b=jnp.zeros((3 * H, 1, Dh), jnp.float32),
            proj_w=proj_w.astype(jnp.bfloat16), proj_b=jnp.zeros((1, D), jnp.float32),
            norm2_g=jnp.ones((1, D), jnp.float32), norm2_b=jnp.zeros((1, D), jnp.float32),
            fc1_w=nrm((D, 4 * D)).astype(jnp.bfloat16), fc1_b=jnp.zeros((1, 4 * D), jnp.float32),
            fc2_w=nrm((4 * D, D)).astype(jnp.bfloat16), fc2_b=jnp.zeros((1, D), jnp.float32))

    encoder = dict(
        cls_token=nrm((D,)),
        pos_embedding=nrm((T, D)),
        patch_w=nrm((C * P, D)).astype(jnp.bfloat16),   # Conv1d(C, D, P, P) weight, flattened
        patch_b=jnp.zeros((1, D), jnp.float32),
        blocks=[blk(cfg["encoder_head"]) for _ in range(cfg["encoder_layer"])],
        ln_g=jnp.ones((1, D), jnp.float32), ln_b=jnp.zeros((1, D), jnp.float32),
    )
    decoder = dict(
        mask_token=nrm((D,)),
        pos_embedding=nrm((T + 1, D)),
        blocks=[blk(cfg["decoder_head"]) for _ in range(cfg["decoder_layer"])],
        head_w=nrm((D, C * P)).astype(jnp.bfloat16),
        head_b=jnp.zeros((1, C * P), jnp.float32),
    )
    return dict(encoder=encoder, decoder=decoder)


# ----------------------------- main -----------------------------------------

if __name__ == "__main__":
    # NOTE: the reference decoder asserts len(unshuffled features) == sequ_len//patch + 1, but the
    # encoder only returns the *selected* backward indexes, so the reference forward is only
    # well-defined for mask_ratio == 0.0; we match that here.
    cfg = dict(
        n_length=16,      # 1-D sequence length (L)
        n_channel=4,      # input channels (C)
        patch_size=2,
        emb_dim=32,
        encoder_layer=2,
        encoder_head=2,
        decoder_layer=2,
        decoder_head=2,
        mask_ratio=0.0,
    )

    root = jax.random.PRNGKey(0)
    pkey, dkey, skey = jax.random.split(root, 3)

    params = init_params(pkey, cfg)
    img = jax.random.normal(dkey, (2, cfg["n_channel"], cfg["n_length"]), jnp.float32)

    predicted_img, mask = mae_vit_forward(img, params, cfg, skey)
    jax.block_until_ready((predicted_img, mask))

    assert predicted_img.shape == (2, cfg["n_channel"], cfg["n_length"])
    assert mask.shape == (2, cfg["n_channel"], cfg["n_length"])
    assert predicted_img.dtype == jnp.float32 and mask.dtype == jnp.float32
    print("KERNEL_OK")
</pallas_src>

<mosaic_0001>
module attributes {stable_mosaic.version = 11 : i64} {
  func.func @_patchify_kernel(%arg0: i32, %arg1: memref<1x8x8xf32, #tpu.memory_space<vmem>>, %arg2: memref<8x32xbf16, #tpu.memory_space<vmem>>, %arg3: memref<1x32xf32, #tpu.memory_space<vmem>>, %arg4: memref<8x32xf32, #tpu.memory_space<vmem>>, %arg5: memref<1x8x32xf32, #tpu.memory_space<vmem>>) attributes {dimension_semantics = [#tpu.dimension_semantics<parallel>], iteration_bounds = array<i64: 2>, scalar_prefetch = 0 : i64, scratch_operands = 0 : i64, tpu.core_type = #tpu.core_type<tc>, window_params = [{transform_indices = @transform_0, window_bounds = array<i64: 1, 8, 8>}, {pipeline_mode = #tpu.pipeline_mode<synchronous>, transform_indices = @transform_1, window_bounds = array<i64: 8, 32>}, {pipeline_mode = #tpu.pipeline_mode<synchronous>, transform_indices = @transform_2, window_bounds = array<i64: 1, 32>}, {pipeline_mode = #tpu.pipeline_mode<synchronous>, transform_indices = @transform_3, window_bounds = array<i64: 8, 32>}, {transform_indices = @transform_4, window_bounds = array<i64: 1, 8, 32>}]} {
    %c0 = arith.constant 0 : index
    %c0_0 = arith.constant 0 : index
    %c0_1 = arith.constant 0 : index
    %0 = vector.load %arg1[%c0, %c0_0, %c0_1] : memref<1x8x8xf32, #tpu.memory_space<vmem>>, vector<1x8x8xf32>
    %1 = vector.shape_cast %0 : vector<1x8x8xf32> to vector<8x8xf32>
    %2 = arith.truncf %1 : vector<8x8xf32> to vector<8x8xbf16>
    %c0_2 = arith.constant 0 : index
    %c0_3 = arith.constant 0 : index
    %3 = vector.load %arg2[%c0_2, %c0_3] : memref<8x32xbf16, #tpu.memory_space<vmem>>, vector<8x32xbf16>
    %cst = arith.constant dense<0.000000e+00> : vector<8x32xf32>
    %4 = tpu.matmul %2, %3, %cst {dimension_numbers = #tpu.dot_dimension_numbers<[1], [0], [0], [1], [0, 0, 1, 1], [], []>} : vector<8x8xbf16>, vector<8x32xbf16>, vector<8x32xf32> -> vector<8x32xf32>
    %c0_4 = arith.constant 0 : index
    %c0_5 = arith.constant 0 : index
    %5 = vector.load %arg3[%c0_4, %c0_5] : memref<1x32xf32, #tpu.memory_space<vmem>>, vector<1x32xf32>
    %6 = vector.broadcast %5 : vector<1x32xf32> to vector<8x32xf32>
    %7 = arith.addf %4, %6 : vector<8x32xf32>
    %c0_6 = arith.constant 0 : index
    %c0_7 = arith.constant 0 : index
    %8 = vector.load %arg4[%c0_6, %c0_7] : memref<8x32xf32, #tpu.memory_space<vmem>>, vector<8x32xf32>
    %9 = arith.addf %7, %8 : vector<8x32xf32>
    %c0_8 = arith.constant 0 : index
    %c0_9 = arith.constant 0 : index
    %c0_10 = arith.constant 0 : index
    %10 = vector.load %arg5[%c0_8, %c0_9, %c0_10] : memref<1x8x32xf32, #tpu.memory_space<vmem>>, vector<1x8x32xf32>
    %11 = vector.shape_cast %10 : vector<1x8x32xf32> to vector<8x32xf32>
    %12 = vector.shape_cast %9 : vector<8x32xf32> to vector<1x8x32xf32>
    tpu.vector_store %arg5[%c0_8, %c0_9, %c0_10], %12 {strides = array<i32>} : memref<1x8x32xf32, #tpu.memory_space<vmem>>, vector<1x8x32xf32>,
    return
  }
  func.func @transform_0(%arg0: i32) -> (i32, i32, i32) {
    %c0_i32 = arith.constant 0 : i32
    %c0_i32_0 = arith.constant 0 : i32
    %c0_i32_1 = arith.constant 0 : i32
    return %arg0, %c0_i32, %c0_i32_0 : i32, i32, i32
  }
  func.func @transform_1(%arg0: i32) -> (i32, i32) {
    %c0_i32 = arith.constant 0 : i32
    %c0_i32_0 = arith.constant 0 : i32
    %c0_i32_1 = arith.constant 0 : i32
    return %c0_i32, %c0_i32_0 : i32, i32
  }
  func.func @transform_2(%arg0: i32) -> (i32, i32) {
    %c0_i32 = arith.constant 0 : i32
    %c0_i32_0 = arith.constant 0 : i32
    %c0_i32_1 = arith.constant 0 : i32
    return %c0_i32, %c0_i32_0 : i32, i32
  }
  func.func @transform_3(%arg0: i32) -> (i32, i32) {
    %c0_i32 = arith.constant 0 : i32
    %c0_i32_0 = arith.constant 0 : i32
    %c0_i32_1 = arith.constant 0 : i32
    return %c0_i32, %c0_i32_0 : i32, i32
  }
  func.func @transform_4(%arg0: i32) -> (i32, i32, i32) {
    %c0_i32 = arith.constant 0 : i32
    %c0_i32_0 = arith.constant 0 : i32
    %c0_i32_1 = arith.constant 0 : i32
    return %arg0, %c0_i32, %c0_i32_0 : i32, i32, i32
  }
}

</mosaic_0001>

<bundles_post_ra>
// kernel: tpu_custom_call.1
= control target key start
LH: loop header
LB: loop body
LE: loop exit
PB: predicated region body
PF: predicated region fallthrough
CT: control target
= control target key end

     0   :  { %9 = vsyncpa [#allocation3], 0  ;;  %s860_s0 = inlined_call_operand.hbm [shape: f32[2,8,8], index: 0, kind: input, shape index: {}]   ;;  %s861_s1 = inlined_call_operand.hbm [shape: bf16[8,32], index: 1, kind: input, shape index: {}]   ;;  %s862_s2 = inlined_call_operand.vmem [shape: f32[1,32], index: 2, kind: input, shape index: {}]   ;;  %s863_s3 = inlined_call_operand.hbm [shape: f32[8,32], index: 3, kind: input, shape index: {}]   ;;  %s864_s4 = inlined_call_operand.hbm [shape: f32[2,8,32], index: 4, kind: output, shape index: {}]  }
   0x1   :  { %11 = vsyncpa [#allocation3 + $0x1], 0 }
   0x2   :  { %12 = vsyncpa [#allocation6], 0 }
   0x3   :  { %13 = vsyncpa [#allocation4], 0 }
   0x4   :  { %15 = vsyncpa [#allocation4 + $0x1], 0  ;;  %s680_s15 = smov 0   ;;  %s682_s16 = smov 0  }
   0x5   :  { %s684_s17 = smov 0   ;;  %s686_s18 = smov 0  }
   0x6 LB: > { %s701_s19 = sadd.s32 4294967295, %s647_s18   ;;  %s404_s20 = sadd.s32 4294967294, %s647_s18   ;;  %s647_s18 = sphi %s686_s18, %s886_s18   ;;  %s643_s17 = sphi %s684_s17, %s885_s17   ;;  %s639_s16 = sphi %s682_s16, %s884_s16   ;;  %s635_s15 = sphi %s680_s15, %s883_s15  }
   0x7   : > { %p41_p0 = scmp.ne.s32.totalorder %s639_s16, %s635_s15  ;;  %p865_p1 = scmp.eq.s32.totalorder %s701_s19, 0 }
   0x8   : > { %p134_p3 = scmp.eq.s32.totalorder %s404_s20, 1  ;;  %p405_p5 = scmp.ge.s32.totalorder %s647_s18, 1 }
   0x9   : > { %p710_p4 = por %p865_p1, %p41_p0  ;;  %p141_p7 = scmp.lt.s32.totalorder %s647_s18, 3 }
   0xa   : > { %p715_p6 = por %p134_p3, %p41_p0  ;;  %s649_s24 = smov [#allocation5]  }
   0xb   : > { %s869_s21 = scalar_select %p710_p4, 1, 0 }
   0xc   : > { %s870_s22 = scalar_select %p715_p6, 1, 0 }
   0xd   : > { %p720_p8 = pnand %p405_p5, %p141_p7  ;;  %s154_s25 = sshll.u32 %s649_s24, 4  ;;  %s155_s25 = int_to_ptr.vmem [resolvable:$true] %s154_s25 }
   0xe   : > { %s650_s26 = smov [#allocation7]   ;;  %s734_s29 = sadd.s32 1, %s647_s18  }
   0xf   : > { %s871_s23 = scalar_select %p720_p8, 1, 0 }
  0x10   : > { %p442_p10 = pneg %p720_p8  ;;  %s168_s27 = sshll.u32 %s650_s26, 4  ;;  %s169_s27 = int_to_ptr.vmem [resolvable:$true] %s168_s27 }
  0x11   : > { %s25_s30 = ssub.s32 %s647_s18, %s734_s29  ;;  %s510_s5 = scalar_lea.vmem %s155_s25, 64 }
  0x12   : > { %p729_p11 = pnand %p442_p10, %p865_p1  ;;  %p511_p13 = scmp.ne.s32.totalorder %s155_s25, %s510_s5 }
  0x13   : > { %p518_p5 = scmp.lt.s32.totalorder %s155_s25, %s155_s25  ;;  %p519_p7 = scmp.lt.s32.totalorder %s510_s5, %s510_s5 }
  0x14   : > { %p501_p12 = pneg %p729_p11 }
  0x15   : > { %p520_p10 = por %p519_p7, %p518_p5 }
  0x16   : > { %p513_p0 = pnand %p511_p13, %p501_p12 }
  0x18   : > { %p514_p3 = pneg %p513_p0 }
  0x1a   : > { %p521_p9 = pnand %p520_p10, %p514_p3 }
  0x1c   : > { %524 = shalt.err (!%p521_p9)
}
  0x1d   : > { %445 = dma.hbm_to_vmem [thread:$0]  (!%p729_p11), %s861_s1, 64, %s155_s25, [#allocation6]  }
  0x1e   : > { %s536_s8 = scalar_lea.vmem %s169_s27, 128  ;;  %p544_p13 = scmp.lt.s32.totalorder %s169_s27, %s169_s27 }
  0x1f   : > { %p537_p1 = scmp.ne.s32.totalorder %s169_s27, %s536_s8  ;;  %p545_p0 = scmp.lt.s32.totalorder %s536_s8, %s536_s8 }
  0x21   : > { %p539_p2 = pnand %p537_p1, %p501_p12  ;;  %p546_p4 = por %p545_p0, %p544_p13 }
  0x23   : > { %p540_p6 = pneg %p539_p2 }
  0x25   : > { %p547_p8 = pnand %p546_p4, %p540_p6 }
  0x27   : > { %550 = shalt.err (!%p547_p8)
}
  0x28   : > { %448 = dma.hbm_to_vmem [thread:$0]  (!%p729_p11), %s863_s3, 128, %s169_s27, [#allocation6]  }
  0x29   : > { %p26_p1 = scmp.eq.s32.totalorder %s25_s30, 0  ;;  %s28_s11 = sadd.s32 1, %s643_s17 }
  0x2a   : > { %p35_p2 = scmp.ne.s32.totalorder %s643_s17, %s639_s16  ;;  %p36_p4 = scmp.eq.s32.totalorder %s647_s18, 0 }
  0x2b   : > { %s761_s12 = scalar_select %p26_p1, %s643_s17, %s28_s11  }
  0x2c   : > { %p37_p6 = por %p36_p4, %p35_p2  ;;  %p873_p8 = scmp.eq.s32.totalorder %s701_s19, 1 }
  0x2d   : > { %p459_p12 = scmp.lt.s32.totalorder %s647_s18, 2  ;;  %s179_s14 = sand.u32 1, %s643_s17  }
  0x2e   : > { %p765_p9 = por %p873_p8, %p35_p2  ;;  %s409_s20 = sshll.u32 %s179_s14, 3 }
  0x2f   : > { %s410_s24 = sshll.u32 %s647_s18, 7  ;;  %s183_s28 = scalar_lea.vmem [#allocation2], %s409_s20 }
  0x30   : > { %s874_s13 = scalar_select %p765_p9, 1, 0 }
  0x31   : > { %s775_s27 = scalar_lea.hbm %s860_s0, %s410_s24  ;;  %s190_s30 = sshll.u32 %s183_s28, 4  ;;  %s191_s30 = int_to_ptr.vmem [resolvable:$true] %s190_s30 }
  0x32   : > { %p777_p11 = pnand %p459_p12, %p37_p6  ;;  %s180_s6 = scalar_lea.sflag [#allocation3], %s179_s14 }
  0x33   : > { %s551_s7 = scalar_lea.hbm %s775_s27, 128  ;;  %s556_s10 = scalar_lea.hbm %s860_s0, 256 }
  0x34   : > { %p552_p3 = scmp.ne.s32.totalorder %s775_s27, %s551_s7  ;;  %p553_p5 = pneg %p777_p11 }
  0x35   : > { %p557_p13 = scmp.lt.s32.totalorder %s775_s27, %s860_s0  ;;  %p558_p0 = scmp.lt.s32.totalorder %s556_s10, %s551_s7 }
  0x36   : > { %p554_p7 = pnand %p553_p5, %p552_p3 }
  0x37   : > { %p559_p1 = por %p558_p0, %p557_p13 }
  0x38   : > { %p555_p10 = pneg %p554_p7 }
  0x3a   : > { %p560_p2 = pnand %p559_p1, %p555_p10 }
  0x3c   : > { %563 = shalt.err (!%p560_p2)
}
  0x3d   : > { %s564_s24 = scalar_lea.vmem %s191_s30, 128  ;;  %s651_s14 = smov [#allocation2]  }
  0x3e   : > { %p565_p4 = scmp.ne.s32.totalorder %s191_s30, %s564_s24  ;;  %s569_s25 = sshll.u32 %s651_s14, 4  ;;  %s570_s25 = int_to_ptr.vmem [resolvable:$false] %s569_s25 }
  0x3f   : > { %s571_s26 = scalar_lea.vmem %s570_s25, 256  ;;  %p572_p12 = scmp.lt.s32.totalorder %s191_s30, %s570_s25 }
  0x40   : > { %p567_p6 = pnand %p565_p4, %p553_p5  ;;  %p573_p3 = scmp.lt.s32.totalorder %s571_s26, %s564_s24 }
  0x42   : > { %p568_p8 = pneg %p567_p6  ;;  %p574_p7 = por %p573_p3, %p572_p12 }
  0x44   : > { %p575_p9 = pnand %p574_p7, %p568_p8 }
  0x46   : > { %578 = shalt.err (!%p575_p9)
}
  0x47   : > { %452 = dma.hbm_to_vmem [thread:$0]  (!%p777_p11), %s775_s27, 128, %s191_s30, %s180_s6  }
  0x48   : > { %p876_p10 = scmp.ne.s32.totalorder %s871_s23, 0 }
  0x49   : > { %s798_s28 = sand.u32 (!%p876_p10), 1, %s639_s16   ;;  %p877_p5 = scmp.ne.s32.totalorder (!%p876_p10), %s869_s21, 0 }
  0x4a   : > { %199 = sbr.rel (%p876_p10) target bundleno = 299 (0x12b), region = 36  ;;  %s412_s7 = sshll.u32 (!%p876_p10), %s798_s28, 3 }
  0x4b   : > { %s202_s8 = scalar_lea.sflag (!%p876_p10), [#allocation3], %s798_s28  ;;  %s205_s9 = scalar_lea.vmem (!%p876_p10), [#allocation2], %s412_s7 }
  0x4f   : > { %622 = dma.done.wait (%p877_p5), %s202_s8, 128  }
  0x50   : > { %624 = vsyncadd (%p877_p5), %s202_s8, 4294967168  ;;  %p878_p9 = scmp.eq.s32.totalorder %s701_s19, 0 }
  0x52   : > { %626 = dma.done.wait (%p878_p9), [#allocation6], 192   ;;  %p879_p11 = pmov %p878_p9 }
  0x53   : > { %v652_v0 = vmov 0.0   ;;  %vm653_vm0 = vmmov 0   ;;  %vm253_vm1 = vcmask 1043456   ;;  %v241_v1 = vld [vmem:[#allocation5] sm:$0xf]  ;;  %v239_v2 = vld [vmem:[%s205_s9] sm:$0xff] }
  0x54   : > { %628 = vsyncadd (%p879_p11), [#allocation6], 4294967104  ;;  %424 = vmatprep.subr.bf16.mxu0 %v652_v0  ;;  %426 = vmatprep.mubr.msk.bf16.mxu0 %vm653_vm0, %v652_v0  ;;  %v255_v3 = vsel %vm253_vm1, %v241_v1, 0  ;;  %v240_v4 = vpack.c.bf16 %v239_v2, %v239_v2  ;;  %vm249_vm2 = vcmask 64512   ;;  %v416_v5 = vld [vmem:[%s862_s2] ss:$0 sm:$0xff] }
  0x55   : > { %425 = vmatpush3.bf16.msra.mxu0 %v255_v3  ;;  %v297_v7 = vld [vmem:[#allocation7] sm:$0xff]  ;;  %s419_s27 = sshll.u32 %s701_s19, 7  ;;  %s237_s30 = scalar_lea.vmem [#allocation8], %s412_s7  ;;  %vm299_vm3 = vcmask 261120  }
  0x56   : > { %s315_s5 = sshll.u32 %s237_s30, 4  ;;  %s817_s11 = scalar_lea.hbm %s864_s4, %s419_s27  ;;  %s819_s5 = int_to_ptr.vmem [resolvable:$true] %s315_s5 }
  0x57   : > { %s302_s19 = scalar_lea.sflag [#allocation4], %s798_s28  ;;  %s579_s20 = scalar_lea.vmem %s819_s5, 128 }
  0x58   : > { %427 = vmatmul.mubr.msk.bf16.vlgmr.msra.gmra.mxu0 %vm249_vm2, %v240_v4  ;;  %p580_p13 = scmp.ne.s32.totalorder %s819_s5, %s579_s20  ;;  %p880_p0 = scmp.ne.s32.totalorder %s874_s13, 0 }
  0x59   : > { %s654_s24 = smov [#allocation8]  }
  0x5a   : > { %p581_p1 = pnand %p580_p13, %p880_p0  ;;  %s583_s14 = sshll.u32 %s654_s24, 4  ;;  %s584_s14 = int_to_ptr.vmem [resolvable:$false] %s583_s14 }
  0x5b   : > { %s585_s25 = scalar_lea.vmem %s584_s14, 256  ;;  %p586_p4 = scmp.lt.s32.totalorder %s819_s5, %s584_s14 }
  0x5c   : > { %p582_p2 = pneg %p581_p1  ;;  %p587_p6 = scmp.lt.s32.totalorder %s585_s25, %s579_s20 }
  0x5e   : > { %p588_p8 = por %p587_p6, %p586_p4 }
  0x60   : > { %p589_p12 = pnand %p588_p8, %p582_p2 }
 0x118   : > { %v291_v6 = vpop.f32.mrf.mxu0 }
 0x119   : > { %v292_v8 = vadd.f32 %v416_v5, %v291_v6 }
 0x11a   : > { %v428_v9 = vpop.f32.mrf.mxu0 }
 0x11b   : > { %v298_v10 = vadd.f32 %v297_v7, %v292_v8 }
 0x11c   : > { %v294_v11 = vpop.f32.mrf.mxu0 }
 0x11d   : > { %300 = vst.msk [vmem:[%s237_s30] sm:$0xff] %vm299_vm3, %v298_v10 }
 0x11e   : > { %v429_v12 = vpop.f32.mrf.mxu0 }
 0x11f   : > { %592 = shalt.err (!%p589_p12)
}
 0x120   : > { %s593_s26 = scalar_lea.hbm %s817_s11, 128  ;;  %s597_s8 = scalar_lea.hbm %s864_s4, 256 }
 0x121   : > { %p594_p3 = scmp.ne.s32.totalorder %s817_s11, %s593_s26  ;;  %p598_p5 = scmp.lt.s32.totalorder %s817_s11, %s864_s4 }
 0x122   : > { %p599_p9 = scmp.lt.s32.totalorder %s597_s8, %s593_s26 }
 0x123   : > { %p595_p7 = pnand %p594_p3, %p880_p0 }
 0x124   : > { %p600_p11 = por %p599_p9, %p598_p5 }
 0x125   : > { %p596_p10 = pneg %p595_p7 }
 0x127   : > { %p601_p13 = pnand %p600_p11, %p596_p10 }
 0x129   : > { %604 = shalt.err (!%p601_p13)
}
 0x12a   : > { %440 = dma.vmem_to_hbm [thread:$0]  (%p880_p0), %s819_s5, 128, %s817_s11, %s302_s19  }
 0x12b PF: > { %s327_s23 = sand.u32 1, %s635_s15   ;;  %p881_p1 = scmp.ne.s32.totalorder %s870_s22, 0 }
 0x12c   : > { %p882_p2 = scmp.ge.s32.totalorder %s647_s18, 2  ;;  %s328_s27 = scalar_lea.sflag [#allocation4], %s327_s23 }
 0x12e   : > { %p454_p4 = pnand %p882_p2, %p881_p1 }
 0x130   : > { %p455_p6 = pneg %p454_p4 }
 0x132   : > { %630 = dma.done.wait (%p455_p6), %s328_s27, 128  }
 0x133   : > { %632 = vsyncadd (%p455_p6), %s328_s27, 4294967168  ;;  %p18_p8 = scmp.ge.s32.totalorder %s734_s29, 4   ;;  %s883_s15 = smov %s639_s16 }
 0x134   : > { %s884_s16 = smov %s643_s17  ;;  %s885_s17 = smov %s761_s12 }
 0x135   : > { %s886_s18 = smov %s734_s29  ;;  %20 = sbr.rel (!%p18_p8) target bundleno = 6 (0x6), region = 89 }
 0x13a   :  { %333 = vsyncpa [#allocation3], 1 }
 0x13b   :  { %335 = vsyncpa [#allocation3 + $0x1], 1 }
 0x13c   :  { %336 = vsyncpa [#allocation6], 1 }
 0x13d   :  { %337 = vsyncpa [#allocation4], 1 }
 0x13e   :  { %339 = vsyncpa [#allocation4 + $0x1], 1 }

</bundles_post_ra>
